<compile_context>
chip_gen: v5e
topology: v5e:2x2
jax: 0.10.0
libtpu: 0.0.40
codegen_flags: <defaults>
</compile_context>

<pallas_src>
import functools
import math

import jax
import jax.numpy as jnp
from jax.experimental import pallas as pl
from jax.experimental.pallas import tpu as pltpu


def _round_up(x, m):
    return (x + m - 1) // m * m


def _tpu_generation():
    try:
        kind = jax.devices()[0].device_kind.lower()
    except Exception:
        return 6
    if "v7" in kind or "7x" in kind:
        return 7
    if "v6" in kind:
        return 6
    if "v5" in kind:
        return 5
    return 6


_GEN = _tpu_generation()
# v7x: 64 MiB physical VMEM per TC -> keep 32 MiB scoped.
# v5e/v6e: 128 MiB physical      -> allow 64 MiB scoped for bigger tiles.
_VMEM_LIMIT = 32 * 1024 * 1024 if _GEN >= 7 else 64 * 1024 * 1024
_TM_CAP = 512 if _GEN >= 7 else 1024


# ----------------------------------------------------------------------------
# Pallas kernel: single-shot matmul with fused bias (+residual) (+ReLU)
# (K grid collapsed to 1 -> no accumulator scratch needed)
# ----------------------------------------------------------------------------
def _mm_kernel(*refs, relu, has_res):
    if has_res:
        a_ref, b_ref, bias_ref, res_ref, o_ref = refs
    else:
        a_ref, b_ref, bias_ref, o_ref = refs
        res_ref = None
    r = jnp.dot(a_ref[...], b_ref[...], preferred_element_type=jnp.float32)
    r = r + bias_ref[...]                        # f32 epilogue (v5e-safe)
    if res_ref is not None:
        r = r + res_ref[...].astype(jnp.float32)
    if relu:
        r = jnp.maximum(r, 0.0)
    o_ref[...] = r.astype(o_ref.dtype)


@functools.lru_cache(maxsize=None)
def _make_matmul(Mp, K, Np, TM, TN, relu, has_res):
    in_specs = [
        pl.BlockSpec((TM, K), lambda i, j: (i, 0)),    # A: full-K block
        pl.BlockSpec((K, TN), lambda i, j: (0, j)),    # B: full-K block
        pl.BlockSpec((1, TN), lambda i, j: (0, j)),    # bias
    ]
    if has_res:
        in_specs.append(pl.BlockSpec((TM, TN), lambda i, j: (i, j)))
    return pl.pallas_call(
        functools.partial(_mm_kernel, relu=relu, has_res=has_res),
        out_shape=jax.ShapeDtypeStruct((Mp, Np), jnp.bfloat16),
        grid_spec=pltpu.PrefetchScalarGridSpec(
            num_scalar_prefetch=0,
            grid=(Mp // TM, Np // TN),
            in_specs=in_specs,
            out_specs=pl.BlockSpec((TM, TN), lambda i, j: (i, j)),
        ),
        compiler_params=pltpu.CompilerParams(
            dimension_semantics=("parallel", "parallel"),
            vmem_limit_bytes=_VMEM_LIMIT),
    )


def _pick_tiles(M, K, N, has_res):
    """Shape/generation-adaptive tiling.  TN is the full padded N (lane-dense
    stores, j grid usually 1); TM rounds tiny M to the bf16 sublane pack (16)
    and caps at 512 (v7x) / 1024 (v5e/v6e); no K tiling (full-K blocks)."""
    Np = _round_up(N, 128)
    TN = Np
    TM = min(_round_up(M, 16), _TM_CAP)
    # v7x megacore: make sure the deep (1,1)-grid layers give both TCs work.
    if _GEN >= 7 and _round_up(M, TM) // TM == 1 and Np >= 256:
        TN = Np // 2

    def vmem_bytes(tm, tn):
        b = 2 * (tm * K + K * tn + tm * tn) * 2 + 2 * tn * 4
        if has_res:
            b += 2 * tm * tn * 2
        return b

    while vmem_bytes(TM, TN) > 0.7 * _VMEM_LIMIT and TM > 256:
        TM //= 2
    while vmem_bytes(TM, TN) > 0.7 * _VMEM_LIMIT and TN % 256 == 0 and TN > 128:
        TN //= 2
    # TODO(synk): K-split (3-D grid + f32 accumulator) fallback if a full-K
    #             block ever exceeds VMEM; never triggered by this network.
    assert vmem_bytes(TM, TN) <= _VMEM_LIMIT, (M, K, N, TM, TN)
    Mp = _round_up(M, TM)
    return Mp, Np, TM, TN


def matmul_bias_act(a, w_packed, bias, relu, residual=None):
    """a:(M,K); w_packed:(K,Np) bf16 pre-packed; bias:(N,) f32;
    residual:(M,N) or None -> bf16 (M,N)."""
    M, K = a.shape
    Kw, Np = w_packed.shape
    assert K == Kw, (K, Kw)
    N = bias.shape[0]
    Mp, Np2, TM, TN = _pick_tiles(M, K, N, residual is not None)
    assert Np2 == Np, (Np2, Np)

    a_p = a.astype(jnp.bfloat16)
    if Mp != M:
        a_p = jnp.pad(a_p, ((0, Mp - M), (0, 0)))
    bias_p = jnp.pad(bias.astype(jnp.float32).reshape(1, -1),
                     ((0, 0), (0, Np - N)))
    args = [a_p, w_packed, bias_p]
    has_res = residual is not None
    if has_res:
        r = residual.astype(jnp.bfloat16)
        if Mp != M or Np != N:
            r = jnp.pad(r, ((0, Mp - M), (0, Np - N)))
        args.append(r)
    out = _make_matmul(Mp, K, Np, TM, TN, bool(relu), has_res)(*args)
    return out[:M, :N]


# ----------------------------------------------------------------------------
# Conv / pool / upsample wrappers (JAX glue around the Pallas matmul kernel)
# ----------------------------------------------------------------------------
def conv2d(x, w_packed, bias, k, stride=1, padding=0, relu=False, residual=None):
    """x: NHWC bf16; w_packed: (k*k*Cin, Np) bf16; bias: (Cout,) f32."""
    N, H, W, C = x.shape
    Cout = bias.shape[0]
    Ho = (H + 2 * padding - k) // stride + 1
    Wo = (W + 2 * padding - k) // stride + 1
    if k == 1 and stride == 1 and padding == 0:
        A = x.reshape(N * H * W, C)
    else:
        # TODO(synk): im2col materialised JAX-side; tap-fused in-kernel reads
        #             would remove the k*k activation expansion.
        xp = jnp.pad(x, ((0, 0), (padding, padding), (padding, padding), (0, 0)))
        patches = []
        for i in range(k):
            for j in range(k):
                patches.append(
                    xp[:, i:i + stride * Ho:stride, j:j + stride * Wo:stride, :])
        A = jnp.concatenate(patches, axis=-1).reshape(N * Ho * Wo, k * k * C)
    res = None if residual is None else residual.reshape(N * Ho * Wo, Cout)
    out = matmul_bias_act(A, w_packed, bias, relu, res)
    return out.reshape(N, Ho, Wo, Cout)


def maxpool2d(x, kernel, stride, padding):
    N, H, W, C = x.shape
    if padding > 0:
        xp = jnp.pad(x, ((0, 0), (padding, padding), (padding, padding), (0, 0)),
                     constant_values=-jnp.inf)
    else:
        xp = x
    Ho = (H + 2 * padding - kernel) // stride + 1
    Wo = (W + 2 * padding - kernel) // stride + 1
    out = None
    for i in range(kernel):
        for j in range(kernel):
            s = xp[:, i:i + stride * Ho:stride, j:j + stride * Wo:stride, :]
            out = s if out is None else jnp.maximum(out, s)
    return out


def upsample2x(x):
    n, h, w, c = x.shape
    x = jnp.broadcast_to(x[:, :, None, :, None, :], (n, h, 2, w, 2, c))
    return x.reshape(n, 2 * h, 2 * w, c)


# ----------------------------------------------------------------------------
# Deterministic parameter construction: synthetic weights, BN folded,
# packed ONCE into kernel-ready (K, Np) bf16 matrices.
# ----------------------------------------------------------------------------
class ParamGen:
    def __init__(self, seed=0):
        self.key = jax.random.PRNGKey(seed)
        self.count = 0

    def next(self):
        self.count += 1
        return jax.random.fold_in(self.key, self.count)


def _pack_conv(w, b):
    """(Cout,Cin,k,k) f32 + (Cout,) f32 -> ((k*k*Cin, Np) bf16, (Cout,) f32)."""
    cout = w.shape[0]
    npad = _round_up(cout, 128)
    wm = jnp.transpose(w, (2, 3, 1, 0)).reshape(-1, cout)
    wm = jnp.pad(wm, ((0, 0), (0, npad - cout))).astype(jnp.bfloat16)
    return wm, b.astype(jnp.float32)


def conv_bn(g, cin, cout, k):
    # TODO(synk): torchvision pretrained ResNet34 weights unavailable
    #             in-script; synthetic weights, eval-mode BN folded.
    w = jax.random.normal(g.next(), (cout, cin, k, k), jnp.float32)
    w = w * math.sqrt(2.0 / (cin * k * k))
    gamma = 1.0 + 0.1 * jax.random.normal(g.next(), (cout,), jnp.float32)
    beta = 0.1 * jax.random.normal(g.next(), (cout,), jnp.float32)
    mean = 0.1 * jax.random.normal(g.next(), (cout,), jnp.float32)
    var = 1.0 + 0.1 * jax.random.uniform(g.next(), (cout,), jnp.float32)
    scale = gamma / jnp.sqrt(var + 1e-5)
    return _pack_conv(w * scale[:, None, None, None], beta - mean * scale)


def conv_plain(g, cin, cout, k):
    w = jax.random.normal(g.next(), (cout, cin, k, k), jnp.float32)
    w = w * math.sqrt(1.0 / (cin * k * k))
    b = 0.01 * jax.random.normal(g.next(), (cout,), jnp.float32)
    return _pack_conv(w, b)


def make_resnet_layer(g, cin, cout, nblocks, stride):
    blocks = []
    for bi in range(nblocks):
        c_in = cin if bi == 0 else cout
        blk = {"conv1": conv_bn(g, c_in, cout, 3),
               "conv2": conv_bn(g, cout, cout, 3)}
        if bi == 0 and (stride != 1 or cin != cout):
            blk["down"] = conv_bn(g, cin, cout, 1)
        blocks.append(blk)
    return blocks


def make_params(seed=0):
    g = ParamGen(seed)
    P = {}
    P["stem"] = conv_bn(g, 3, 64, 7)                       # conv1+bn1+relu
    P["layer1"] = make_resnet_layer(g, 64, 64, 3, 1)
    P["layer2"] = make_resnet_layer(g, 64, 128, 4, 2)
    P["layer3"] = make_resnet_layer(g, 128, 256, 6, 2)
    P["layer4"] = make_resnet_layer(g, 256, 512, 3, 2)
    P["ls"] = {"c1": conv_bn(g, 512, 512, 3), "c2": conv_bn(g, 512, 512, 3)}

    def dec(cin, cout, cskip):
        return {"c1": conv_bn(g, cin + cskip, cout, 3),
                "c2": conv_bn(g, cout, cout, 3)}

    P["d6"] = dec(512, 256, 512)
    P["d5"] = dec(256, 128, 256)
    P["d4"] = dec(128, 64, 128)
    P["d3"] = dec(64, 64, 64)
    P["d2"] = dec(64, 32, 64)
    P["d1"] = dec(32, 32, 3)
    P["out"] = conv_plain(g, 32, 2, 1)
    return P


# ----------------------------------------------------------------------------
# Forward pass (single jit over the whole network)
# ----------------------------------------------------------------------------
_LAYER_STRIDE = {1: 1, 2: 2, 3: 2, 4: 2}


def basic_block(x, blk, stride):
    identity = x
    out = conv2d(x, *blk["conv1"], k=3, stride=stride, padding=1, relu=True)
    if "down" in blk:
        identity = conv2d(x, *blk["down"], k=1, stride=stride, padding=0,
                          relu=False)
    # residual add + ReLU fused into conv2's matmul epilogue
    return conv2d(out, *blk["conv2"], k=3, stride=1, padding=1, relu=True,
                  residual=identity)


def decoder_block(x, skip, p):
    x = upsample2x(x)
    x = jnp.concatenate([x, skip], axis=-1)
    x = conv2d(x, *p["c1"], k=3, stride=1, padding=1, relu=True)
    x = conv2d(x, *p["c2"], k=3, stride=1, padding=1, relu=True)
    return x


@jax.jit
def unet_res_encoder(x_nchw, P):
    # NCHW in/out (PyTorch convention); NHWC bf16 internally.
    x = jnp.transpose(x_nchw, (0, 2, 3, 1)).astype(jnp.bfloat16)
    inp = x
    feats = {}

    # layer0: ResNet stem (conv7x7 s2 + folded BN + ReLU), stored pre-maxpool
    x = conv2d(x, *P["stem"], k=7, stride=2, padding=3, relu=True)
    feats["layer0"] = x
    x = maxpool2d(x, kernel=3, stride=2, padding=1)

    for li in range(1, 5):
        for bi, blk in enumerate(P[f"layer{li}"]):
            s = _LAYER_STRIDE[li] if bi == 0 else 1
            x = basic_block(x, blk, s)
        feats[f"layer{li}"] = x

    x = maxpool2d(x, kernel=2, stride=2, padding=0)

    # LatentSpace(512, 512): double conv
    x = conv2d(x, *P["ls"]["c1"], k=3, stride=1, padding=1, relu=True)
    x = conv2d(x, *P["ls"]["c2"], k=3, stride=1, padding=1, relu=True)

    x = decoder_block(x, feats["layer4"], P["d6"])
    x = decoder_block(x, feats["layer3"], P["d5"])
    x = decoder_block(x, feats["layer2"], P["d4"])
    x = decoder_block(x, feats["layer1"], P["d3"])
    x = decoder_block(x, feats["layer0"], P["d2"])
    x = decoder_block(x, inp, P["d1"])

    # OutConv(32, 2): 1x1 conv
    x = conv2d(x, *P["out"], k=1, stride=1, padding=0, relu=False)
    return jnp.transpose(x, (0, 3, 1, 2)).astype(jnp.float32)


if __name__ == "__main__":
    # ---- kernel sanity check vs f32 reference (bf16 tolerance) -------------
    ka, kb = jax.random.split(jax.random.PRNGKey(1))
    A = jax.random.normal(ka, (50, 147), jnp.float32)
    Wt = jax.random.normal(kb, (147, 64), jnp.float32) / math.sqrt(147.0)
    bias = 0.1 * jnp.arange(64, dtype=jnp.float32)
    res = jax.random.normal(jax.random.PRNGKey(2), (50, 64), jnp.float32)
    Wp = jnp.pad(Wt, ((0, 0), (0, 64))).astype(jnp.bfloat16)
    got = matmul_bias_act(A.astype(jnp.bfloat16), Wp, bias, True,
                          res.astype(jnp.bfloat16)).astype(jnp.float32)
    ref = jnp.maximum(
        A.astype(jnp.bfloat16).astype(jnp.float32)
        @ Wp[:, :64].astype(jnp.float32) + bias
        + res.astype(jnp.bfloat16).astype(jnp.float32), 0.0)
    assert bool(jnp.allclose(got, ref, rtol=5e-2, atol=1e-1)), "kernel mismatch"

    # ---- full forward -------------------------------------------------------
    # NCHW, 3 channels, spatial 64 (smallest size surviving /64 downsampling).
    key = jax.random.PRNGKey(0)
    x = jax.random.normal(key, (2, 3, 64, 64), jnp.float32)

    params = make_params(seed=0)
    out = unet_res_encoder(x, params)
    out = jax.block_until_ready(out)

    assert out.shape == (2, 2, 64, 64), out.shape
    assert bool(jnp.all(jnp.isfinite(out)))
    print("KERNEL_OK")
</pallas_src>

<mosaic_0001>
module attributes {stable_mosaic.version = 11 : i64} {
  func.func @_mm_kernel(%arg0: i32, %arg1: i32, %arg2: memref<64x147xbf16, #tpu.memory_space<vmem>>, %arg3: memref<147x128xbf16, #tpu.memory_space<vmem>>, %arg4: memref<1x128xf32, #tpu.memory_space<vmem>>, %arg5: memref<64x128xbf16, #tpu.memory_space<vmem>>, %arg6: memref<64x128xbf16, #tpu.memory_space<vmem>>) attributes {dimension_semantics = [#tpu.dimension_semantics<parallel>, #tpu.dimension_semantics<parallel>], iteration_bounds = array<i64: 1, 1>, scalar_prefetch = 0 : i64, scratch_operands = 0 : i64, tpu.core_type = #tpu.core_type<tc>, window_params = [{transform_indices = @transform_0, window_bounds = array<i64: 64, 147>}, {transform_indices = @transform_1, window_bounds = array<i64: 147, 128>}, {transform_indices = @transform_2, window_bounds = array<i64: 1, 128>}, {transform_indices = @transform_3, window_bounds = array<i64: 64, 128>}, {transform_indices = @transform_4, window_bounds = array<i64: 64, 128>}]} {
    %c0 = arith.constant 0 : index
    %c0_0 = arith.constant 0 : index
    %0 = vector.load %arg2[%c0, %c0_0] : memref<64x147xbf16, #tpu.memory_space<vmem>>, vector<64x147xbf16>
    %c0_1 = arith.constant 0 : index
    %c0_2 = arith.constant 0 : index
    %1 = vector.load %arg3[%c0_1, %c0_2] : memref<147x128xbf16, #tpu.memory_space<vmem>>, vector<147x128xbf16>
    %cst = arith.constant dense<0.000000e+00> : vector<64x128xf32>
    %2 = tpu.matmul %0, %1, %cst {dimension_numbers = #tpu.dot_dimension_numbers<[1], [0], [0], [1], [0, 0, 1, 1], [], []>} : vector<64x147xbf16>, vector<147x128xbf16>, vector<64x128xf32> -> vector<64x128xf32>
    %c0_3 = arith.constant 0 : index
    %c0_4 = arith.constant 0 : index
    %3 = vector.load %arg4[%c0_3, %c0_4] : memref<1x128xf32, #tpu.memory_space<vmem>>, vector<1x128xf32>
    %4 = vector.broadcast %3 : vector<1x128xf32> to vector<64x128xf32>
    %5 = arith.addf %2, %4 : vector<64x128xf32>
    %c0_5 = arith.constant 0 : index
    %c0_6 = arith.constant 0 : index
    %6 = vector.load %arg5[%c0_5, %c0_6] : memref<64x128xbf16, #tpu.memory_space<vmem>>, vector<64x128xbf16>
    %7 = arith.extf %6 : vector<64x128xbf16> to vector<64x128xf32>
    %8 = arith.addf %5, %7 : vector<64x128xf32>
    %cst_7 = arith.constant 0.000000e+00 : f32
    %9 = vector.broadcast %cst_7 : f32 to vector<64x128xf32>
    %10 = arith.maximumf %8, %9 : vector<64x128xf32>
    %11 = arith.truncf %10 : vector<64x128xf32> to vector<64x128xbf16>
    %c0_8 = arith.constant 0 : index
    %c0_9 = arith.constant 0 : index
    %12 = vector.load %arg6[%c0_8, %c0_9] : memref<64x128xbf16, #tpu.memory_space<vmem>>, vector<64x128xbf16>
    tpu.vector_store %arg6[%c0_8, %c0_9], %11 {strides = array<i32>} : memref<64x128xbf16, #tpu.memory_space<vmem>>, vector<64x128xbf16>,
    return
  }
  func.func @transform_0(%arg0: i32, %arg1: i32) -> (i32, i32) {
    %c0_i32 = arith.constant 0 : i32
    %c0_i32_0 = arith.constant 0 : i32
    return %arg0, %c0_i32 : i32, i32
  }
  func.func @transform_1(%arg0: i32, %arg1: i32) -> (i32, i32) {
    %c0_i32 = arith.constant 0 : i32
    %c0_i32_0 = arith.constant 0 : i32
    return %c0_i32, %arg1 : i32, i32
  }
  func.func @transform_2(%arg0: i32, %arg1: i32) -> (i32, i32) {
    %c0_i32 = arith.constant 0 : i32
    %c0_i32_0 = arith.constant 0 : i32
    return %c0_i32, %arg1 : i32, i32
  }
  func.func @transform_3(%arg0: i32, %arg1: i32) -> (i32, i32) {
    %c0_i32 = arith.constant 0 : i32
    return %arg0, %arg1 : i32, i32
  }
  func.func @transform_4(%arg0: i32, %arg1: i32) -> (i32, i32) {
    %c0_i32 = arith.constant 0 : i32
    return %arg0, %arg1 : i32, i32
  }
}

</mosaic_0001>

<bundles_post_ra>
// kernel: tpu_custom_call.1
= control target key start
LH: loop header
LB: loop body
LE: loop exit
PB: predicated region body
PF: predicated region fallthrough
CT: control target
= control target key end

     0   :  { %9 = vsyncpa [#allocation3], 0  ;;  %s651_s0 = inlined_call_operand.hbm [shape: bf16[64,147], index: 0, kind: input, shape index: {}]   ;;  %s652_s1 = inlined_call_operand.hbm [shape: bf16[147,128], index: 1, kind: input, shape index: {}]   ;;  %s653_s2 = inlined_call_operand.vmem [shape: f32[1,128], index: 2, kind: input, shape index: {}]   ;;  %s654_s3 = inlined_call_operand.hbm [shape: bf16[64,128], index: 3, kind: input, shape index: {}]   ;;  %s655_s4 = inlined_call_operand.hbm [shape: bf16[64,128], index: 4, kind: output, shape index: {}]  }
   0x1   :  { %10 = vsyncpa [#allocation6], 0  ;;  %s29_s17 = sshll.u32 %s652_s1, 4  ;;  %s30_s17 = int_to_ptr.hbm [resolvable:$true] %s29_s17 }
   0x2   :  { %11 = vsyncpa [#allocation4], 0  ;;  %s589_s18 = smov [#allocation5]   ;;  %s16_s22 = sshll.u32 %s651_s0, 4  ;;  %s17_s22 = int_to_ptr.hbm [resolvable:$true] %s16_s22 }
   0x3   :  { %s31_s19 = sshll.u32 %s589_s18, 4  ;;  %s590_s23 = smov 64   ;;  %s32_s19 = int_to_ptr.vmem [resolvable:$true] %s31_s19 }
   0x4   :  { %s591_s24 = smov 4   ;;  %s592_s25 = smov [#allocation2]  }
   0x5   :  { %37 = dma.hbm_to_vmem [thread:$0]  %s30_s17, 1216, %s32_s19, [#allocation6], %s590_s23, %s590_s23, %s591_s24  }
   0x6   :  { %s18_s26 = sshll.u32 %s592_s25, 4  ;;  %s593_s1 = smov 128   ;;  %s19_s26 = int_to_ptr.vmem [resolvable:$true] %s18_s26 }
   0x7   :  { %s594_s27 = smov 8   ;;  %s44_s30 = sshll.u32 %s654_s3, 4  ;;  %s45_s30 = int_to_ptr.hbm [resolvable:$true] %s44_s30 }
   0x8   :  { %24 = dma.hbm_to_vmem [thread:$0]  %s17_s22, 1024, %s19_s26, [#allocation3], %s593_s1, %s593_s1, %s594_s27  }
   0x9   :  { %s595_s5 = smov [#allocation7]  }
   0xa   :  { %s46_s0 = sshll.u32 %s595_s5, 4  ;;  %s47_s0 = int_to_ptr.vmem [resolvable:$true] %s46_s0 }
   0xb   :  { %52 = dma.hbm_to_vmem [thread:$0]  %s45_s30, 512, %s47_s0, [#allocation6], %s590_s23, %s590_s23, %s591_s24  }
   0xc   :  { %583 = dma.done.wait [#allocation3], 1024  }
   0xd   :  { %584 = vsyncadd [#allocation3], 4294966272 }
   0xe   :  { %585 = dma.done.wait [#allocation6], 1728  }
   0xf   :  { %586 = vsyncadd [#allocation6], 4294965568  ;;  %vm203_vm0 = vcmask 1040384   ;;  %vm204_vm1 = vcmask 1041408   ;;  %v596_v0 = vmov 65535   ;;  %v423_v2 = vld [vmem:[#allocation5 + $0x38] sm:$0xff] }
  0x10   :  { %v205_v1 = vsel %vm203_vm0, 4294967295, %v596_v0  ;;  %v92_v3 = vld [vmem:[#allocation5 + $0x48] sm:$0x3]  ;;  %210 = vmatpush.bf16.msra.mxu0 %v423_v2  ;;  %467 = vmatpush.bf16.msra.mxu2 %v423_v2  ;;  %v422_v5 = vld [vmem:[#allocation5 + $0x30] sm:$0xff]  ;;  %v424_v10 = vld [vmem:[#allocation5 + $0x40] sm:$0xff]  ;;  %vm190_vm2 = vcmask 154624  }
  0x11   :  { %v170_v4 = vunpack.c.l.b16 %v92_v3  ;;  %v206_v6 = vsel %vm204_vm1, %v205_v1, 0  ;;  %v421_v9 = vld [vmem:[#allocation5 + $0x28] sm:$0xff]  ;;  %v410_v11 = vld [vmem:[#allocation2 + $0x14] sm:$0xf]  ;;  %v348_v12 = vld [vmem:[#allocation2 + $0x18] sm:$0xf0] }
  0x12   :  { %v408_v13 = vld [vmem:[#allocation2 + $0x4] sm:$0xf]  ;;  %v340_v14 = vld [vmem:[#allocation2 + $0x8] sm:$0xf0]  ;;  %v351_v15 = vor.u32 %v410_v11, %v348_v12  ;;  %v419_v18 = vld [vmem:[#allocation5 + $0x18] sm:$0xff]  ;;  %s322_s10 = sshll.u32 %s655_s4, 4  ;;  %s323_s10 = int_to_ptr.hbm [resolvable:$true] %s322_s10 }
  0x13   :  { %v180_v7 = vpack.c.b16 %v170_v4, %v170_v4  ;;  %v420_v16 = vld [vmem:[#allocation5 + $0x20] sm:$0xff]  ;;  %v343_v17 = vor.u32 %v408_v13, %v340_v14  ;;  %v418_v19 = vld [vmem:[#allocation5 + $0x10] sm:$0xff]  ;;  %v417_v20 = vld [vmem:[#allocation5 + $0x8] sm:$0xff] }
  0x14   :  { %211 = vmatpush.bf16.msra.mxu0 %v422_v5  ;;  %468 = vmatpush.bf16.msra.mxu2 %v422_v5  ;;  %v412_v21 = vld [vmem:[#allocation2 + $0x24] sm:$0xf]  ;;  %v356_v22 = vld [vmem:[#allocation2 + $0x28] sm:$0xf0]  ;;  %v338_v25 = vld [vmem:[#allocation2] sm:$0xf] }
  0x15   :  { %v208_v8 = vand.u32 %v206_v6, %v180_v7  ;;  %v359_v23 = vor.u32 %v412_v21, %v356_v22  ;;  %v416_v24 = vld [vmem:[#allocation5] sm:$0xff]  ;;  %v409_v26 = vld [vmem:[#allocation2 + $0x4] sm:$0xf0]  ;;  %v414_v31 = vld [vmem:[#allocation2 + $0x34] sm:$0xf] }
  0x16   :  { %v354_v27 = vld [vmem:[#allocation2 + $0x20] sm:$0xf]  ;;  %v413_v28 = vld [vmem:[#allocation2 + $0x24] sm:$0xf0]  ;;  %v339_v29 = vor.u32 %v409_v26, %v338_v25  ;;  %v364_v32 = vld [vmem:[#allocation2 + $0x38] sm:$0xf0] }
  0x17   :  { %475 = vmatpush.bf16.msra.mxu3 %v208_v8  ;;  %245 = vmatpush.bf16.msra.mxu1 %v208_v8  ;;  %v355_v30 = vor.u32 %v413_v28, %v354_v27  ;;  %v367_v33 = vor.u32 %v414_v31, %v364_v32  ;;  %v346_v34 = vld [vmem:[#allocation2 + $0x10] sm:$0xf]  ;;  %v411_v35 = vld [vmem:[#allocation2 + $0x14] sm:$0xf0]  ;;  %v486_v43 = vld [vmem:[%s653_s2] ss:$0 sm:$0xff] }
  0x18   :  { %212 = vmatpush.bf16.msra.mxu0 %v421_v9  ;;  %469 = vmatpush.bf16.msra.mxu2 %v421_v9  ;;  %v362_v36 = vld [vmem:[#allocation2 + $0x30] sm:$0xf]  ;;  %v415_v37 = vld [vmem:[#allocation2 + $0x34] sm:$0xf0]  ;;  %v347_v38 = vor.u32 %v411_v35, %v346_v34  ;;  %v462_v57 = vld [vmem:[#allocation7 + $0x10] sm:$0xff]   ;;  %s597_s2 = smov [#allocation8]  }
  0x19   :  { %v363_v39 = vor.u32 %v415_v37, %v362_v36  ;;  %v426_v47 = vld [vmem:[#allocation7] sm:$0xff]   ;;  %v435_v62 = vunpack.c.l.bf16 %v462_v57  ;;  %v436_v3 = vunpack.c.h.bf16 %v462_v57  ;;  %s320_s7 = sshll.u32 %s597_s2, 4  ;;  %s321_s7 = int_to_ptr.vmem [resolvable:$true] %s320_s7 }
  0x1a   :  { %v427_v49 = vunpack.c.l.bf16 %v426_v47  ;;  %v428_v54 = vunpack.c.h.bf16 %v426_v47 }
  0x1b   :  { %476 = vmatpush.bf16.msra.mxu3 %v424_v10  ;;  %246 = vmatpush.bf16.msra.mxu1 %v424_v10  ;;  %v461_v10 = vld [vmem:[#allocation7 + $0x8] sm:$0xff]  }
  0x1c   :  { %213 = vmatpush.bf16.msra.mxu0 %v420_v16  ;;  %470 = vmatpush.bf16.msra.mxu2 %v420_v16  ;;  %v431_v14 = vunpack.c.l.bf16 %v461_v10 }
  0x1e   :  { %405 = vmatmul.msk.bf16.vlgmr.msra.gmra.mxu3 %vm190_vm2, %v351_v15  ;;  %404 = vmatmul.msk.bf16.vlgmr.msra.gmra.mxu1 %vm190_vm2, %v343_v17 }
  0x20   :  { %214 = vmatpush.bf16.msra.mxu0 %v419_v18  ;;  %471 = vmatpush.bf16.msra.mxu2 %v419_v18 }
  0x24   :  { %215 = vmatpush.bf16.msra.mxu0 %v418_v19  ;;  %472 = vmatpush.bf16.msra.mxu2 %v418_v19 }
  0x28   :  { %216 = vmatpush.bf16.msra.mxu0 %v417_v20  ;;  %473 = vmatpush.bf16.msra.mxu2 %v417_v20  ;;  %v432_v20 = vunpack.c.h.bf16 %v461_v10 }
  0x2c   :  { %217 = vmatpush.bf16.msra.mxu0 %v416_v24  ;;  %474 = vmatpush.bf16.msra.mxu2 %v416_v24 }
  0x2e   :  { %406 = vmatmul.msk.bf16.gmra.mxu3 %vm190_vm2, %v359_v23  ;;  %v463_v23 = vld [vmem:[#allocation7 + $0x18] sm:$0xff]  }
  0x2f   :  { %218 = vmatmul.bf16.vlgmr.msra.gmra.mxu0 %v339_v29  ;;  %228 = vmatmul.bf16.vlgmr.msra.gmra.mxu2 %v355_v30  ;;  %v439_v27 = vunpack.c.l.bf16 %v463_v23  ;;  %v440_v32 = vunpack.c.h.bf16 %v463_v23 }
  0x3e   :  { %407 = vmatmul.msk.bf16.gmra.mxu3 %vm190_vm2, %v367_v33 }
  0x3f   :  { %223 = vmatmul.bf16.gmra.mxu0 %v347_v38  ;;  %233 = vmatmul.bf16.gmra.mxu2 %v363_v39 }
  0x9b   :  { %v248_v42 = vpop.f32.mrf.mxu1 }
  0xa1   :  { %v253_v40 = vpop.f32.mrf.mxu3 }
  0xa3   :  { %v250_v52 = vpop.f32.mrf.mxu1 }
  0xa9   :  { %v255_v41 = vpop.f32.mrf.mxu3 }
  0xac   :  { %v219_v44 = vpop.f32.mrf.mxu0 }
  0xad   :  { %v220_v45 = vadd.f32 %v486_v43, %v219_v44 }
  0xaf   :  { %v249_v48 = vadd.f32 %v248_v42, %v220_v45 }
  0xb1   :  { %v258_v46 = vpop.f32.mrf.mxu3  ;;  %v284_v56 = vadd.f32 %v427_v49, %v249_v48 }
  0xb2   :  { %v229_v50 = vpop.f32.mrf.mxu2 }
  0xb3   :  { %v230_v55 = vadd.f32 %v486_v43, %v229_v50  ;;  %v292_v63 = vmax.f32 %v284_v56, 0.0 }
  0xb4   :  { %v221_v51 = vpop.f32.mrf.mxu0 }
  0xb5   :  { %v222_v53 = vadd.f32 %v486_v43, %v221_v51  ;;  %v259_v61 = vadd.f32 %v258_v46, %v230_v55 }
  0xb7   :  { %v251_v58 = vadd.f32 %v250_v52, %v222_v53  ;;  %v288_v6 = vadd.f32 %v435_v62, %v259_v61 }
  0xb9   :  { %v285_v59 = vadd.f32 %v428_v54, %v251_v58  ;;  %v260_v60 = vpop.f32.mrf.mxu3  ;;  %v296_v11 = vmax.f32 %v288_v6, 0.0 }
  0xba   :  { %v231_v1 = vpop.f32.mrf.mxu2 }
  0xbb   :  { %v293_v0 = vmax.f32 %v285_v59, 0.0  ;;  %v232_v2 = vadd.f32 %v486_v43, %v231_v1 }
  0xbc   :  { %v224_v4 = vpop.f32.mrf.mxu0 }
  0xbd   :  { %v444_v5 = vpack.c.bf16 %v293_v0, %v292_v63  ;;  %v261_v7 = vadd.f32 %v260_v60, %v232_v2  ;;  %v225_v8 = vadd.f32 %v486_v43, %v224_v4 }
  0xbf   :  { %445 = vst [vmem:[#allocation8] sm:$0xff] %v444_v5   ;;  %v289_v9 = vadd.f32 %v436_v3, %v261_v7  ;;  %v254_v13 = vadd.f32 %v253_v40, %v225_v8 }
  0xc1   :  { %v297_v12 = vmax.f32 %v289_v9, 0.0  ;;  %v263_v15 = vpop.f32.mrf.mxu3  ;;  %v286_v22 = vadd.f32 %v431_v14, %v254_v13 }
  0xc2   :  { %v234_v16 = vpop.f32.mrf.mxu2 }
  0xc3   :  { %v454_v17 = vpack.c.bf16 %v297_v12, %v296_v11  ;;  %v235_v21 = vadd.f32 %v486_v43, %v234_v16  ;;  %v294_v28 = vmax.f32 %v286_v22, 0.0 }
  0xc4   :  { %v226_v18 = vpop.f32.mrf.mxu0 }
  0xc5   :  { %v227_v19 = vadd.f32 %v486_v43, %v226_v18  ;;  %465 = vst [vmem:[#allocation8 + $0x10] sm:$0xff] %v454_v17   ;;  %v264_v26 = vadd.f32 %v263_v15, %v235_v21 }
  0xc7   :  { %v256_v24 = vadd.f32 %v255_v41, %v227_v19  ;;  %v290_v35 = vadd.f32 %v439_v27, %v264_v26 }
  0xc9   :  { %v287_v25 = vadd.f32 %v432_v20, %v256_v24  ;;  %v265_v34 = vpop.f32.mrf.mxu3  ;;  %v298_v38 = vmax.f32 %v290_v35, 0.0 }
  0xca   :  { %v236_v30 = vpop.f32.mrf.mxu2 }
  0xcb   :  { %v295_v29 = vmax.f32 %v287_v25, 0.0  ;;  %v237_v31 = vadd.f32 %v486_v43, %v236_v30 }
  0xcd   :  { %v449_v33 = vpack.c.bf16 %v295_v29, %v294_v28  ;;  %v266_v36 = vadd.f32 %v265_v34, %v237_v31 }
  0xcf   :  { %464 = vst [vmem:[#allocation8 + $0x8] sm:$0xff] %v449_v33   ;;  %v291_v37 = vadd.f32 %v440_v32, %v266_v36 }
  0xd1   :  { %v299_v39 = vmax.f32 %v291_v37, 0.0 }
  0xd3   :  { %v459_v40 = vpack.c.bf16 %v299_v39, %v298_v38 }
  0xd5   :  { %466 = vst [vmem:[#allocation8 + $0x18] sm:$0xff] %v459_v40  }
  0xd6   :  { %328 = dma.vmem_to_hbm [thread:$0]  %s321_s7, 512, %s323_s10, [#allocation4], %s590_s23, %s590_s23, %s591_s24  }
  0xd7   :  { %587 = dma.done.wait [#allocation4], 512  }
  0xd8   :  { %588 = vsyncadd [#allocation4], 4294966784 }
  0xd9   :  { %333 = vsyncpa [#allocation3], 1 }
  0xda   :  { %334 = vsyncpa [#allocation6], 1 }
  0xdb   :  { %335 = vsyncpa [#allocation4], 1 }

</bundles_post_ra>
